<compile_context>
chip_gen: v7x
topology: tpu7x:2x2x1
jax: 0.10.0
libtpu: 0.0.40
codegen_flags: <defaults>
</compile_context>

<pallas_src>
import functools

import jax
import jax.numpy as jnp
from jax import lax
from jax.experimental import pallas as pl
from jax.experimental.pallas import tpu as pltpu


def attend_kernel(q_ref, k_ref, v_ref, o_ref, m_scr, l_scr, acc_scr, *, scale):
    # q_ref: (1, tq, D)  k_ref/v_ref: (1, tk, D)  o_ref: (1, tq, D)
    # m_scr/l_scr: (tq, 1) f32   acc_scr: (tq, D) f32
    kv = pl.program_id(2)

    @pl.when(kv == 0)
    def _():
        m_scr[...] = jnp.full_like(m_scr, -jnp.inf)
        l_scr[...] = jnp.zeros_like(l_scr)
        acc_scr[...] = jnp.zeros_like(acc_scr)

    q = q_ref[0]  # (tq, D)
    k = k_ref[0]  # (tk, D)
    v = v_ref[0]  # (tk, D)

    # sim = (q @ k^T) * scale — contraction on last dim of both operands, so the
    # MXU consumes k natively (no XLU transpose), f32 accumulation.
    s = lax.dot_general(q, k, (((1,), (1,)), ((), ())),
                        preferred_element_type=jnp.float32) * scale  # (tq, tk)

    m_prev = m_scr[...]
    m_new = jnp.maximum(m_prev, s.max(axis=-1, keepdims=True))
    alpha = jnp.exp(m_prev - m_new)
    p = jnp.exp(s - m_new)

    l_scr[...] = alpha * l_scr[...] + p.sum(axis=-1, keepdims=True)
    acc_scr[...] = alpha * acc_scr[...] + jnp.dot(
        p.astype(v.dtype), v, preferred_element_type=jnp.float32)
    m_scr[...] = m_new

    @pl.when(kv == pl.num_programs(2) - 1)
    def _():
        # Exact divide (approx reciprocal would cost ~1e-4 rel error).
        o_ref[0] = (acc_scr[...] / l_scr[...]).astype(o_ref.dtype)


def attend_forward(q, k, v, *, scale=None, tq=128, tk=128):
    """q, k, v: (B, H, N, D).  Returns (B, H, N, D) attention output."""
    B, H, N, D = q.shape
    assert k.shape == (B, H, N, D) and v.shape == (B, H, N, D)
    scale_val = float(D) ** -0.5 if scale is None else float(scale)

    tq = min(tq, N)
    tk = min(tk, N)
    # No masked-tail path implemented: require exact tiling (no silent drop).
    assert N % tq == 0 and N % tk == 0, "seq len must be divisible by tile sizes"

    BH = B * H
    # (B, H, N, D) -> (B*H, N, D): pure reshape of contiguous dims, no transpose,
    # no extra HBM pass.
    q3 = q.reshape(BH, N, D)
    k3 = k.reshape(BH, N, D)
    v3 = v.reshape(BH, N, D)

    grid = (BH, pl.cdiv(N, tq), pl.cdiv(N, tk))
    kernel = functools.partial(attend_kernel, scale=scale_val)

    itemsize = jnp.dtype(q.dtype).itemsize
    cost = pl.CostEstimate(
        flops=4 * BH * N * N * D,          # QK^T + PV, 2*N*N*D each
        transcendentals=BH * N * N,        # exp
        bytes_accessed=4 * BH * N * D * itemsize,  # q, k, v read + o write
    )

    out3 = pl.pallas_call(
        kernel,
        out_shape=jax.ShapeDtypeStruct((BH, N, D), q.dtype),
        grid_spec=pltpu.PrefetchScalarGridSpec(
            num_scalar_prefetch=0,
            grid=grid,
            in_specs=[
                pl.BlockSpec((1, tq, D), lambda b, qi, ki: (b, qi, 0)),  # q
                pl.BlockSpec((1, tk, D), lambda b, qi, ki: (b, ki, 0)),  # k
                pl.BlockSpec((1, tk, D), lambda b, qi, ki: (b, ki, 0)),  # v
            ],
            out_specs=pl.BlockSpec((1, tq, D), lambda b, qi, ki: (b, qi, 0)),
            scratch_shapes=[
                pltpu.VMEM((tq, 1), jnp.float32),   # running max
                pltpu.VMEM((tq, 1), jnp.float32),   # running denom
                pltpu.VMEM((tq, D), jnp.float32),   # output accumulator
            ],
        ),
        compiler_params=pltpu.CompilerParams(
            dimension_semantics=("parallel", "parallel", "arbitrary")),
        cost_estimate=cost,
    )(q3, k3, v3)

    return out3.reshape(B, H, N, D)


def attend_ref(q, k, v, scale=None):
    d = q.shape[-1]
    scale = d ** -0.5 if scale is None else scale
    sim = jnp.einsum('bhid,bhjd->bhij', q, k) * scale
    attn = jax.nn.softmax(sim, axis=-1)
    return jnp.einsum('bhij,bhjd->bhid', attn, v)


if __name__ == "__main__":
    key = jax.random.PRNGKey(0)
    kq, kk, kvv = jax.random.split(key, 3)

    # Small shapes consistent with a unet1d attention block.
    B, H, N, D = 2, 2, 256, 64
    q = jax.random.normal(kq, (B, H, N, D), dtype=jnp.float32)
    k = jax.random.normal(kk, (B, H, N, D), dtype=jnp.float32)
    v = jax.random.normal(kvv, (B, H, N, D), dtype=jnp.float32)

    out = attend_forward(q, k, v)
    out = jax.block_until_ready(out)

    ref = attend_ref(q, k, v)
    assert out.shape == q.shape and out.dtype == q.dtype
    assert jnp.allclose(out, ref, atol=2e-5, rtol=2e-5), "mismatch vs reference"

    print("KERNEL_OK")
</pallas_src>

<mosaic_0001>
module attributes {stable_mosaic.version = 11 : i64} {
  func.func @attend_kernel(%arg0: i32, %arg1: i32, %arg2: i32, %arg3: memref<1x128x64xf32, #tpu.memory_space<vmem>>, %arg4: memref<1x128x64xf32, #tpu.memory_space<vmem>>, %arg5: memref<1x128x64xf32, #tpu.memory_space<vmem>>, %arg6: memref<1x128x64xf32, #tpu.memory_space<vmem>>, %arg7: memref<128x1xf32, #tpu.memory_space<vmem>>, %arg8: memref<128x1xf32, #tpu.memory_space<vmem>>, %arg9: memref<128x64xf32, #tpu.memory_space<vmem>>) attributes {dimension_semantics = [#tpu.dimension_semantics<parallel>, #tpu.dimension_semantics<parallel>, #tpu.dimension_semantics<arbitrary>], iteration_bounds = array<i64: 4, 2, 2>, scalar_prefetch = 0 : i64, scratch_operands = 3 : i64, tpu.core_type = #tpu.core_type<tc>, window_params = [{transform_indices = @transform_0, window_bounds = array<i64: 1, 128, 64>}, {transform_indices = @transform_1, window_bounds = array<i64: 1, 128, 64>}, {transform_indices = @transform_2, window_bounds = array<i64: 1, 128, 64>}, {transform_indices = @transform_3, window_bounds = array<i64: 1, 128, 64>}]} {
    %c0_i32 = arith.constant 0 : i32
    %0 = arith.cmpi eq, %arg2, %c0_i32 : i32
    %1 = arith.extui %0 : i1 to i32
    %c0_i32_0 = arith.constant 0 : i32
    %2 = arith.cmpi ne, %1, %c0_i32_0 : i32
    scf.if %2 {
      %cst_26 = arith.constant 0xFF800000 : f32
      %37 = vector.broadcast %cst_26 : f32 to vector<128x1xf32>
      %c0_27 = arith.constant 0 : index
      %c0_28 = arith.constant 0 : index
      %38 = vector.load %arg7[%c0_27, %c0_28] : memref<128x1xf32, #tpu.memory_space<vmem>>, vector<128x1xf32>
      tpu.vector_store %arg7[%c0_27, %c0_28], %37 {strides = array<i32>} : memref<128x1xf32, #tpu.memory_space<vmem>>, vector<128x1xf32>,
      %cst_29 = arith.constant 0.000000e+00 : f32
      %39 = vector.broadcast %cst_29 : f32 to vector<128x1xf32>
      %c0_30 = arith.constant 0 : index
      %c0_31 = arith.constant 0 : index
      %40 = vector.load %arg8[%c0_30, %c0_31] : memref<128x1xf32, #tpu.memory_space<vmem>>, vector<128x1xf32>
      tpu.vector_store %arg8[%c0_30, %c0_31], %39 {strides = array<i32>} : memref<128x1xf32, #tpu.memory_space<vmem>>, vector<128x1xf32>,
      %cst_32 = arith.constant 0.000000e+00 : f32
      %41 = vector.broadcast %cst_32 : f32 to vector<128x64xf32>
      %c0_33 = arith.constant 0 : index
      %c0_34 = arith.constant 0 : index
      %42 = vector.load %arg9[%c0_33, %c0_34] : memref<128x64xf32, #tpu.memory_space<vmem>>, vector<128x64xf32>
      tpu.vector_store %arg9[%c0_33, %c0_34], %41 {strides = array<i32>} : memref<128x64xf32, #tpu.memory_space<vmem>>, vector<128x64xf32>,
    } else {
    }
    %c0 = arith.constant 0 : index
    %c0_1 = arith.constant 0 : index
    %c0_2 = arith.constant 0 : index
    %3 = vector.load %arg3[%c0, %c0_1, %c0_2] : memref<1x128x64xf32, #tpu.memory_space<vmem>>, vector<1x128x64xf32>
    %4 = vector.shape_cast %3 : vector<1x128x64xf32> to vector<128x64xf32>
    %c0_3 = arith.constant 0 : index
    %c0_4 = arith.constant 0 : index
    %c0_5 = arith.constant 0 : index
    %5 = vector.load %arg4[%c0_3, %c0_4, %c0_5] : memref<1x128x64xf32, #tpu.memory_space<vmem>>, vector<1x128x64xf32>
    %6 = vector.shape_cast %5 : vector<1x128x64xf32> to vector<128x64xf32>
    %c0_6 = arith.constant 0 : index
    %c0_7 = arith.constant 0 : index
    %c0_8 = arith.constant 0 : index
    %7 = vector.load %arg5[%c0_6, %c0_7, %c0_8] : memref<1x128x64xf32, #tpu.memory_space<vmem>>, vector<1x128x64xf32>
    %8 = vector.shape_cast %7 : vector<1x128x64xf32> to vector<128x64xf32>
    %cst = arith.constant dense<0.000000e+00> : vector<128x128xf32>
    %9 = tpu.matmul %4, %6, %cst {dimension_numbers = #tpu.dot_dimension_numbers<[1], [1], [0], [0], [0, 0, 1, 0], [], []>} : vector<128x64xf32>, vector<128x64xf32>, vector<128x128xf32> -> vector<128x128xf32>
    %cst_9 = arith.constant 1.250000e-01 : f32
    %10 = vector.broadcast %cst_9 : f32 to vector<128x128xf32>
    %11 = arith.mulf %9, %10 : vector<128x128xf32>
    %c0_10 = arith.constant 0 : index
    %c0_11 = arith.constant 0 : index
    %12 = vector.load %arg7[%c0_10, %c0_11] : memref<128x1xf32, #tpu.memory_space<vmem>>, vector<128x1xf32>
    %cst_12 = arith.constant dense<0xFF800000> : vector<128xf32>
    %13 = vector.multi_reduction <maximumf>, %11, %cst_12 [1] : vector<128x128xf32> to vector<128xf32>
    %14 = vector.shape_cast %13 : vector<128xf32> to vector<128x1xf32>
    %15 = arith.maximumf %12, %14 : vector<128x1xf32>
    %16 = arith.subf %12, %15 : vector<128x1xf32>
    %17 = math.exp %16 : vector<128x1xf32>
    %18 = vector.broadcast %15 : vector<128x1xf32> to vector<128x128xf32>
    %19 = arith.subf %11, %18 : vector<128x128xf32>
    %20 = math.exp %19 : vector<128x128xf32>
    %c0_13 = arith.constant 0 : index
    %c0_14 = arith.constant 0 : index
    %21 = vector.load %arg8[%c0_13, %c0_14] : memref<128x1xf32, #tpu.memory_space<vmem>>, vector<128x1xf32>
    %22 = arith.mulf %17, %21 : vector<128x1xf32>
    %cst_15 = arith.constant dense<0.000000e+00> : vector<128xf32>
    %23 = vector.multi_reduction <add>, %20, %cst_15 [1] : vector<128x128xf32> to vector<128xf32>
    %24 = vector.shape_cast %23 : vector<128xf32> to vector<128x1xf32>
    %25 = arith.addf %22, %24 : vector<128x1xf32>
    %c0_16 = arith.constant 0 : index
    %c0_17 = arith.constant 0 : index
    %26 = vector.load %arg8[%c0_16, %c0_17] : memref<128x1xf32, #tpu.memory_space<vmem>>, vector<128x1xf32>
    tpu.vector_store %arg8[%c0_16, %c0_17], %25 {strides = array<i32>} : memref<128x1xf32, #tpu.memory_space<vmem>>, vector<128x1xf32>,
    %c0_18 = arith.constant 0 : index
    %c0_19 = arith.constant 0 : index
    %27 = vector.load %arg9[%c0_18, %c0_19] : memref<128x64xf32, #tpu.memory_space<vmem>>, vector<128x64xf32>
    %28 = vector.broadcast %17 : vector<128x1xf32> to vector<128x64xf32>
    %29 = arith.mulf %28, %27 : vector<128x64xf32>
    %cst_20 = arith.constant dense<0.000000e+00> : vector<128x64xf32>
    %30 = tpu.matmul %20, %8, %cst_20 {dimension_numbers = #tpu.dot_dimension_numbers<[1], [0], [0], [1], [0, 0, 1, 1], [], []>} : vector<128x128xf32>, vector<128x64xf32>, vector<128x64xf32> -> vector<128x64xf32>
    %31 = arith.addf %29, %30 : vector<128x64xf32>
    %c0_21 = arith.constant 0 : index
    %c0_22 = arith.constant 0 : index
    %32 = vector.load %arg9[%c0_21, %c0_22] : memref<128x64xf32, #tpu.memory_space<vmem>>, vector<128x64xf32>
    tpu.vector_store %arg9[%c0_21, %c0_22], %31 {strides = array<i32>} : memref<128x64xf32, #tpu.memory_space<vmem>>, vector<128x64xf32>,
    %c0_23 = arith.constant 0 : index
    %c0_24 = arith.constant 0 : index
    %33 = vector.load %arg7[%c0_23, %c0_24] : memref<128x1xf32, #tpu.memory_space<vmem>>, vector<128x1xf32>
    tpu.vector_store %arg7[%c0_23, %c0_24], %15 {strides = array<i32>} : memref<128x1xf32, #tpu.memory_space<vmem>>, vector<128x1xf32>,
    %c1_i32 = arith.constant 1 : i32
    %34 = arith.cmpi eq, %arg2, %c1_i32 : i32
    %35 = arith.extui %34 : i1 to i32
    %c0_i32_25 = arith.constant 0 : i32
    %36 = arith.cmpi ne, %35, %c0_i32_25 : i32
    scf.if %36 {
      %c0_26 = arith.constant 0 : index
      %c0_27 = arith.constant 0 : index
      %37 = vector.load %arg9[%c0_26, %c0_27] : memref<128x64xf32, #tpu.memory_space<vmem>>, vector<128x64xf32>
      %c0_28 = arith.constant 0 : index
      %c0_29 = arith.constant 0 : index
      %38 = vector.load %arg8[%c0_28, %c0_29] : memref<128x1xf32, #tpu.memory_space<vmem>>, vector<128x1xf32>
      %39 = vector.broadcast %38 : vector<128x1xf32> to vector<128x64xf32>
      %40 = arith.divf %37, %39 : vector<128x64xf32>
      %c0_30 = arith.constant 0 : index
      %c0_31 = arith.constant 0 : index
      %c0_32 = arith.constant 0 : index
      %41 = vector.load %arg6[%c0_30, %c0_31, %c0_32] : memref<1x128x64xf32, #tpu.memory_space<vmem>>, vector<1x128x64xf32>
      %42 = vector.shape_cast %41 : vector<1x128x64xf32> to vector<128x64xf32>
      %43 = vector.shape_cast %40 : vector<128x64xf32> to vector<1x128x64xf32>
      tpu.vector_store %arg6[%c0_30, %c0_31, %c0_32], %43 {strides = array<i32>} : memref<1x128x64xf32, #tpu.memory_space<vmem>>, vector<1x128x64xf32>,
    } else {
    }
    return
  }
  func.func @transform_0(%arg0: i32, %arg1: i32, %arg2: i32) -> (i32, i32, i32) {
    %c0_i32 = arith.constant 0 : i32
    %c0_i32_0 = arith.constant 0 : i32
    return %arg0, %arg1, %c0_i32 : i32, i32, i32
  }
  func.func @transform_1(%arg0: i32, %arg1: i32, %arg2: i32) -> (i32, i32, i32) {
    %c0_i32 = arith.constant 0 : i32
    %c0_i32_0 = arith.constant 0 : i32
    return %arg0, %arg2, %c0_i32 : i32, i32, i32
  }
  func.func @transform_2(%arg0: i32, %arg1: i32, %arg2: i32) -> (i32, i32, i32) {
    %c0_i32 = arith.constant 0 : i32
    %c0_i32_0 = arith.constant 0 : i32
    return %arg0, %arg2, %c0_i32 : i32, i32, i32
  }
  func.func @transform_3(%arg0: i32, %arg1: i32, %arg2: i32) -> (i32, i32, i32) {
    %c0_i32 = arith.constant 0 : i32
    %c0_i32_0 = arith.constant 0 : i32
    return %arg0, %arg1, %c0_i32 : i32, i32, i32
  }
}

</mosaic_0001>

<bundles_post_ra>
// kernel: tpu_custom_call.1
= control target key start
LH: loop header
LB: loop body
LE: loop exit
PB: predicated region body
PF: predicated region fallthrough
CT: control target
= control target key end

     0   :  { %s2136_s12 = smov 0   ;;  %s2138_s13 = smov 0   ;;  %s2737_s0 = inlined_call_operand.vmem [shape: f32[4,256,64], index: 0, kind: input, shape index: {}]   ;;  %s2738_s1 = inlined_call_operand.vmem [shape: f32[4,256,64], index: 1, kind: input, shape index: {}]   ;;  %s2739_s2 = inlined_call_operand.vmem [shape: f32[4,256,64], index: 2, kind: input, shape index: {}]   ;;  %s2740_s3 = inlined_call_operand.vmem [shape: f32[4,256,64], index: 3, kind: output, shape index: {}]  }
   0x1   :  { %s2140_s14 = smov 0   ;;  %s2142_s15 = smov 0  }
   0x2   :  { %s2144_s16 = smov 0   ;;  %s2146_s17 = smov 0  }
   0x3   :  { %s2148_s18 = smov 0  }
   0x4 LB: > { %s25_s19 = sadd.s32 1, %s2098_s15  ;;  %s28_s20 = sadd.s32 1, %s2102_s16  ;;  %s2110_s18 = sphi %s2148_s18, %s13_s18   ;;  %s2106_s17 = sphi %s2146_s17, %s2748_s17   ;;  %s2102_s16 = sphi %s2144_s16, %s2747_s16   ;;  %s2098_s15 = sphi %s2142_s15, %s2746_s15   ;;  %s2094_s14 = sphi %s2140_s14, %s2745_s14   ;;  %s2090_s13 = sphi %s2138_s13, %s2744_s13   ;;  %s2086_s12 = sphi %s2136_s12, %s2743_s12  }
   0x5   : > { %p26_p0 = scmp.ge.s32.totalorder %s25_s19, 2  ;;  %p1591_p1 = scmp.ge.s32.totalorder %s2110_s18, 1 }
   0x6   : > { %p199_p2 = scmp.lt.s32.totalorder %s2110_s18, 17  ;;  %s32_s21 = sadd.s32 1, %s2106_s17 }
   0x7   : > { %s2750_s19 = smov (%p26_p0, %s25_s19), 0  ;;  %s2752_s20 = smov (!%p26_p0, %s28_s20), %s2102_s16 }
   0x8   : > { %p200_p3 = pnand %p1591_p1, %p199_p2  ;;  %p30_p4 = scmp.ge.s32.totalorder %s2752_s20, 2 }
   0x9   : > { %s1592_s22 = sshll.u32 (!%p200_p3), %s2090_s13, 4  ;;  %p250_p6 = scmp.lt.s32.totalorder (!%p200_p3), %s2094_s14, 3 }
   0xa   : > { %s2754_s20 = smov (%p30_p4, %s2752_s20), 0  ;;  %s2756_s21 = smov (!%p30_p4, %s32_s21), %s2106_s17 }
   0xb   : > { %p34_p5 = scmp.ge.s32.totalorder %s2756_s21, 4  ;;  %203 = sbr.rel (%p200_p3) target bundleno = 1002 (0x3ea), region = 32 }
   0xc   : > { %p252_p7 = scmp.lt.s32.totalorder (!%p200_p3), %s1592_s22, 31  ;;  %s1595_s23 = sshll.u32 (!%p200_p3), %s2086_s12, 4 }
   0xd   : > { %s2758_s21 = smov (%p34_p5, %s2756_s21), 0  ;;  %p262_p8 = scmp.lt.s32.totalorder (!%p200_p3), %s1595_s23, 31 }
   0xe   : > { %p1604_p9 = scmp.ne.s32.totalorder (!%p200_p3), %s2086_s12, 0 }
  0x12   : > { %s2760_s14 = smov (!%p250_p6, %s2094_s14), 3  ;;  %s2762_s22 = smov (!%p252_p7, %s1592_s22), 31 }
  0x13   : > { %s1593_s24 = sshll.u32 %s2760_s14, 5  ;;  %s2764_s23 = smov (!%p262_p8, %s1595_s23), 31  ;;  %vm293_vm0 = vcmask (!%p1604_p9), 7168   ;;  %vm326_vm1 = vcmask (!%p1604_p9), 523264   ;;  %v2112_v0 = vmov (!%p1604_p9), -inf   ;;  %v2113_v1 = vmov (!%p1604_p9), 0.0  }
  0x14   : > { %s255_s25 = sadd.s32 %s1593_s24, %s2762_s22  ;;  %s265_s6 = sadd.s32 %s1593_s24, %s2764_s23  ;;  %294 = vst.msk [vmem:[#allocation2] sm:$0xff] (!%p1604_p9), %vm293_vm0, %v2112_v0  ;;  %295 = vst.msk [vmem:[#allocation2 + $0x8] sm:$0xff] (!%p1604_p9), %vm293_vm0, %v2112_v0 }
  0x15   : > { %s1594_s26 = sshll.u32 %s255_s25, 3  ;;  %s1597_s7 = sshll.u32 %s265_s6, 3  ;;  %296 = vst.msk [vmem:[#allocation2 + $0x10] sm:$0xff] (!%p1604_p9), %vm293_vm0, %v2112_v0  ;;  %297 = vst.msk [vmem:[#allocation2 + $0x18] sm:$0xff] (!%p1604_p9), %vm293_vm0, %v2112_v0 }
  0x16   : > { %s2184_s29 = scalar_lea.vmem %s2737_s0, %s1594_s26  ;;  %s2189_s5 = scalar_lea.vmem %s2740_s3, %s1594_s26  ;;  %298 = vst.msk [vmem:[#allocation2 + $0x20] sm:$0xff] (!%p1604_p9), %vm293_vm0, %v2112_v0  ;;  %299 = vst.msk [vmem:[#allocation2 + $0x28] sm:$0xff] (!%p1604_p9), %vm293_vm0, %v2112_v0 }
  0x17   : > { %s2194_s10 = scalar_lea.vmem %s2738_s1, %s1597_s7  ;;  %s2199_s14 = scalar_lea.vmem %s2739_s2, %s1597_s7  ;;  %300 = vst.msk [vmem:[#allocation2 + $0x30] sm:$0xff] (!%p1604_p9), %vm293_vm0, %v2112_v0  ;;  %301 = vst.msk [vmem:[#allocation2 + $0x38] sm:$0xff] (!%p1604_p9), %vm293_vm0, %v2112_v0 }
  0x18   : > { %292 = sbr.rel (%p1604_p9) target bundleno = 44 (0x2c), region = 36  ;;  %302 = vst.msk [vmem:[#allocation2 + $0x40] sm:$0xff] (!%p1604_p9), %vm293_vm0, %v2112_v0  ;;  %303 = vst.msk [vmem:[#allocation2 + $0x48] sm:$0xff] (!%p1604_p9), %vm293_vm0, %v2112_v0 }
  0x19   : > { %304 = vst.msk [vmem:[#allocation2 + $0x50] sm:$0xff] (!%p1604_p9), %vm293_vm0, %v2112_v0  ;;  %305 = vst.msk [vmem:[#allocation2 + $0x58] sm:$0xff] (!%p1604_p9), %vm293_vm0, %v2112_v0 }
  0x1a   : > { %306 = vst.msk [vmem:[#allocation2 + $0x60] sm:$0xff] (!%p1604_p9), %vm293_vm0, %v2112_v0  ;;  %307 = vst.msk [vmem:[#allocation2 + $0x68] sm:$0xff] (!%p1604_p9), %vm293_vm0, %v2112_v0 }
  0x1b   : > { %308 = vst.msk [vmem:[#allocation2 + $0x70] sm:$0xff] (!%p1604_p9), %vm293_vm0, %v2112_v0  ;;  %309 = vst.msk [vmem:[#allocation2 + $0x78] sm:$0xff] (!%p1604_p9), %vm293_vm0, %v2112_v0 }
  0x1c   : > { %310 = vst.msk [vmem:[#allocation3] sm:$0xff] (!%p1604_p9), %vm293_vm0, %v2113_v1  ;;  %311 = vst.msk [vmem:[#allocation3 + $0x8] sm:$0xff] (!%p1604_p9), %vm293_vm0, %v2113_v1 }
  0x1d   : > { %312 = vst.msk [vmem:[#allocation3 + $0x10] sm:$0xff] (!%p1604_p9), %vm293_vm0, %v2113_v1  ;;  %313 = vst.msk [vmem:[#allocation3 + $0x18] sm:$0xff] (!%p1604_p9), %vm293_vm0, %v2113_v1 }
  0x1e   : > { %314 = vst.msk [vmem:[#allocation3 + $0x20] sm:$0xff] (!%p1604_p9), %vm293_vm0, %v2113_v1  ;;  %315 = vst.msk [vmem:[#allocation3 + $0x28] sm:$0xff] (!%p1604_p9), %vm293_vm0, %v2113_v1 }
  0x1f   : > { %316 = vst.msk [vmem:[#allocation3 + $0x30] sm:$0xff] %vm293_vm0, %v2113_v1  ;;  %317 = vst.msk [vmem:[#allocation3 + $0x38] sm:$0xff] %vm293_vm0, %v2113_v1 }
  0x20   : > { %318 = vst.msk [vmem:[#allocation3 + $0x40] sm:$0xff] %vm293_vm0, %v2113_v1  ;;  %319 = vst.msk [vmem:[#allocation3 + $0x48] sm:$0xff] %vm293_vm0, %v2113_v1 }
  0x21   : > { %320 = vst.msk [vmem:[#allocation3 + $0x50] sm:$0xff] %vm293_vm0, %v2113_v1  ;;  %321 = vst.msk [vmem:[#allocation3 + $0x58] sm:$0xff] %vm293_vm0, %v2113_v1 }
  0x22   : > { %322 = vst.msk [vmem:[#allocation3 + $0x60] sm:$0xff] %vm293_vm0, %v2113_v1  ;;  %323 = vst.msk [vmem:[#allocation3 + $0x68] sm:$0xff] %vm293_vm0, %v2113_v1 }
  0x23   : > { %324 = vst.msk [vmem:[#allocation3 + $0x70] sm:$0xff] %vm293_vm0, %v2113_v1  ;;  %325 = vst.msk [vmem:[#allocation3 + $0x78] sm:$0xff] %vm293_vm0, %v2113_v1 }
  0x24   : > { %327 = vst.msk [vmem:[#allocation4] sm:$0xff] %vm326_vm1, %v2113_v1  ;;  %328 = vst.msk [vmem:[#allocation4 + $0x8] sm:$0xff] %vm326_vm1, %v2113_v1 }
  0x25   : > { %329 = vst.msk [vmem:[#allocation4 + $0x10] sm:$0xff] %vm326_vm1, %v2113_v1  ;;  %330 = vst.msk [vmem:[#allocation4 + $0x18] sm:$0xff] %vm326_vm1, %v2113_v1 }
  0x26   : > { %331 = vst.msk [vmem:[#allocation4 + $0x20] sm:$0xff] %vm326_vm1, %v2113_v1  ;;  %332 = vst.msk [vmem:[#allocation4 + $0x28] sm:$0xff] %vm326_vm1, %v2113_v1 }
  0x27   : > { %333 = vst.msk [vmem:[#allocation4 + $0x30] sm:$0xff] %vm326_vm1, %v2113_v1  ;;  %334 = vst.msk [vmem:[#allocation4 + $0x38] sm:$0xff] %vm326_vm1, %v2113_v1 }
  0x28   : > { %335 = vst.msk [vmem:[#allocation4 + $0x40] sm:$0xff] %vm326_vm1, %v2113_v1  ;;  %336 = vst.msk [vmem:[#allocation4 + $0x48] sm:$0xff] %vm326_vm1, %v2113_v1 }
  0x29   : > { %337 = vst.msk [vmem:[#allocation4 + $0x50] sm:$0xff] %vm326_vm1, %v2113_v1  ;;  %338 = vst.msk [vmem:[#allocation4 + $0x58] sm:$0xff] %vm326_vm1, %v2113_v1 }
  0x2a   : > { %339 = vst.msk [vmem:[#allocation4 + $0x60] sm:$0xff] %vm326_vm1, %v2113_v1  ;;  %340 = vst.msk [vmem:[#allocation4 + $0x68] sm:$0xff] %vm326_vm1, %v2113_v1 }
  0x2b   : > { %341 = vst.msk [vmem:[#allocation4 + $0x70] sm:$0xff] %vm326_vm1, %v2113_v1  ;;  %342 = vst.msk [vmem:[#allocation4 + $0x78] sm:$0xff] %vm326_vm1, %v2113_v1 }
  0x2c PF: > { %v359_v2 = vld [vmem:[%s2194_s10] sm:$0xff]  ;;  %v360_v3 = vld [vmem:[%s2194_s10 + $0x8] sm:$0xff]  ;;  %vm391_vm2 = vcmask 523264   ;;  %v361_v4 = vld [vmem:[%s2194_s10 + $0x10] sm:$0xff]  ;;  %v2114_v63 = vmov 0   ;;  %vm969_vm4 = vcmask 7168  }
  0x2d   : > { %v1816_v5 = vpack.c.bf16 %v360_v3, %v359_v2  ;;  %vm2255_vm3 = vmpackc.low %vm391_vm2, %vm391_vm2  ;;  %v362_v7 = vld [vmem:[%s2194_s10 + $0x18] sm:$0xff]  ;;  %v343_v9 = vld [vmem:[%s2184_s29] sm:$0xff]  ;;  %1956 = vset.pattern.permute.xlu0 %v2114_v63  ;;  %1957 = vset.pattern.permute.xlu1 %v2114_v63  ;;  %p1637_p10 = scmp.ne.s32.totalorder %s2086_s12, 1 }
  0x2e   : > { %v1822_v8 = vpack.c.bf16 %v362_v7, %v361_v4  ;;  %v363_v10 = vld [vmem:[%s2194_s10 + $0x20] sm:$0xff]  ;;  %v364_v11 = vld [vmem:[%s2194_s10 + $0x28] sm:$0xff]  ;;  %1736 = vmatprep.mubr.msk.f32.mxu0 %vm391_vm2, %v343_v9  ;;  %v365_v13 = vld [vmem:[%s2194_s10 + $0x30] sm:$0xff] }
  0x2f   : > { %1818 = vmatprep.subr.msk.bf16.mxu0 %vm2255_vm3, %v1816_v5  ;;  %v1828_v12 = vpack.c.bf16 %v364_v11, %v363_v10  ;;  %v366_v14 = vld [vmem:[%s2194_s10 + $0x38] sm:$0xff]  ;;  %v367_v16 = vld [vmem:[%s2194_s10 + $0x40] sm:$0xff]  ;;  %v368_v17 = vld [vmem:[%s2194_s10 + $0x48] sm:$0xff] }
  0x30   : > { %1821 = vmatpush3.bf16.xpose.msk.msra.mxu0 %vm2255_vm3, %v1816_v5  ;;  %v1834_v15 = vpack.c.bf16 %v366_v14, %v365_v13  ;;  %v1840_v18 = vpack.c.bf16 %v368_v17, %v367_v16  ;;  %v369_v19 = vld [vmem:[%s2194_s10 + $0x50] sm:$0xff]  ;;  %v370_v20 = vld [vmem:[%s2194_s10 + $0x58] sm:$0xff]  ;;  %v371_v22 = vld [vmem:[%s2194_s10 + $0x60] sm:$0xff] }
  0x31   : > { %1824 = vmatprep.subr.msk.bf16.mxu0 %vm2255_vm3, %v1822_v8  ;;  %v1846_v21 = vpack.c.bf16 %v370_v20, %v369_v19  ;;  %v372_v23 = vld [vmem:[%s2194_s10 + $0x68] sm:$0xff]  ;;  %v373_v25 = vld [vmem:[%s2194_s10 + $0x70] sm:$0xff]  ;;  %v374_v26 = vld [vmem:[%s2194_s10 + $0x78] sm:$0xff] }
  0x32   : > { %v1852_v24 = vpack.c.bf16 %v372_v23, %v371_v22  ;;  %v1858_v27 = vpack.c.bf16 %v374_v26, %v373_v25  ;;  %v344_v28 = vld [vmem:[%s2184_s29 + $0x8] sm:$0xff]  ;;  %v345_v29 = vld [vmem:[%s2184_s29 + $0x10] sm:$0xff]  ;;  %v346_v30 = vld [vmem:[%s2184_s29 + $0x18] sm:$0xff] }
  0x33   : > { %v347_v31 = vld [vmem:[%s2184_s29 + $0x20] sm:$0xff]  ;;  %v348_v32 = vld [vmem:[%s2184_s29 + $0x28] sm:$0xff]  ;;  %v349_v33 = vld [vmem:[%s2184_s29 + $0x30] sm:$0xff] }
  0x34   : > { %v350_v34 = vld [vmem:[%s2184_s29 + $0x38] sm:$0xff]  ;;  %v351_v35 = vld [vmem:[%s2184_s29 + $0x40] sm:$0xff]  ;;  %v352_v36 = vld [vmem:[%s2184_s29 + $0x48] sm:$0xff] }
  0x35   : > { %v353_v37 = vld [vmem:[%s2184_s29 + $0x50] sm:$0xff]  ;;  %v354_v38 = vld [vmem:[%s2184_s29 + $0x58] sm:$0xff]  ;;  %v355_v39 = vld [vmem:[%s2184_s29 + $0x60] sm:$0xff] }
  0x36   : > { %v356_v40 = vld [vmem:[%s2184_s29 + $0x68] sm:$0xff]  ;;  %v357_v41 = vld [vmem:[%s2184_s29 + $0x70] sm:$0xff]  ;;  %v358_v42 = vld [vmem:[%s2184_s29 + $0x78] sm:$0xff] }
  0x37   : > { %v376_v13 = vld [vmem:[%s2199_s14 + $0x8] sm:$0xff]  ;;  %v377_v14 = vld [vmem:[%s2199_s14 + $0x10] sm:$0xff]  ;;  %v378_v16 = vld [vmem:[%s2199_s14 + $0x18] sm:$0xff] }
  0x38   : > { %1827 = vmatpush3.bf16.xpose.msk.msra.mxu0 %vm2255_vm3, %v1822_v8  ;;  %v1868_v17 = vpack.c.bf16 %v378_v16, %v377_v14  ;;  %v380_v19 = vld [vmem:[%s2199_s14 + $0x28] sm:$0xff]  ;;  %v382_v22 = vld [vmem:[%s2199_s14 + $0x38] sm:$0xff]  ;;  %v2459_v16 = vld [vmem:[#allocation2 + $0x50] sm:$0xff] }
  0x39   : > { %1830 = vmatprep.subr.msk.bf16.mxu0 %vm2255_vm3, %v1828_v12  ;;  %v2441_v63 = vld [vmem:[#allocation2 + $0x38] sm:$0xff]  ;;  %v658_v14 = vld [vmem:[#allocation2 + $0x48] sm:$0xff] }
  0x40   : > { %1833 = vmatpush3.bf16.xpose.msk.msra.mxu0 %vm2255_vm3, %v1828_v12  ;;  %v375_v12 = vld [vmem:[%s2199_s14] sm:$0xff] }
  0x41   : > { %1836 = vmatprep.subr.msk.bf16.mxu0 %vm2255_vm3, %v1834_v15 }
  0x48   : > { %1839 = vmatpush3.bf16.xpose.msk.msra.mxu0 %vm2255_vm3, %v1834_v15  ;;  %v1864_v15 = vpack.c.bf16 %v376_v13, %v375_v12 }
  0x49   : > { %1842 = vmatprep.subr.msk.bf16.mxu0 %vm2255_vm3, %v1840_v18 }
  0x4a   : > { %1865 = vmatprep.subr.bf16.mxu1 %v1864_v15 }
  0x4b   : > { %1867 = vmatpush3.bf16.msra.mxu1 %v1864_v15 }
  0x4c   : > { %1869 = vmatprep.subr.bf16.mxu1 %v1868_v17 }
  0x4f   : > { %1871 = vmatpush3.bf16.msra.mxu1 %v1868_v17 }
  0x50   : > { %1845 = vmatpush3.bf16.xpose.msk.msra.mxu0 %vm2255_vm3, %v1840_v18  ;;  %v379_v18 = vld [vmem:[%s2199_s14 + $0x20] sm:$0xff] }
  0x51   : > { %1848 = vmatprep.subr.msk.bf16.mxu0 %vm2255_vm3, %v1846_v21  ;;  %v1872_v20 = vpack.c.bf16 %v380_v19, %v379_v18 }
  0x53   : > { %1873 = vmatprep.subr.bf16.mxu1 %v1872_v20 }
  0x54   : > { %1875 = vmatpush3.bf16.msra.mxu1 %v1872_v20 }
  0x58   : > { %1851 = vmatpush3.bf16.xpose.msk.msra.mxu0 %vm2255_vm3, %v1846_v21  ;;  %v381_v21 = vld [vmem:[%s2199_s14 + $0x30] sm:$0xff] }
  0x59   : > { %1854 = vmatprep.subr.msk.bf16.mxu0 %vm2255_vm3, %v1852_v24  ;;  %v1876_v23 = vpack.c.bf16 %v382_v22, %v381_v21  ;;  %v660_v21 = vld [vmem:[#allocation2 + $0x58] sm:$0xff] }
  0x5b   : > { %1877 = vmatprep.subr.bf16.mxu1 %v1876_v23 }
  0x5c   : > { %1879 = vmatpush3.bf16.msra.mxu1 %v1876_v23  ;;  %v2469_v23 = vld [vmem:[#allocation2 + $0x60] sm:$0xff] }
  0x60   : > { %1857 = vmatpush3.bf16.xpose.msk.msra.mxu0 %vm2255_vm3, %v1852_v24  ;;  %v2392_v24 = vld [vmem:[#allocation2] sm:$0xff] }
  0x61   : > { %1860 = vmatprep.subr.msk.bf16.mxu0 %vm2255_vm3, %v1858_v27 }
  0x68   : > { %1863 = vmatpush3.bf16.xpose.msk.msra.mxu0 %vm2255_vm3, %v1858_v27  ;;  %v2397_v27 = vld [vmem:[#allocation2 + $0x18] sm:$0xff] }
  0x6f   : > { %1737 = vmatmul.mubr.msk.f32.vlgmr.msra.gmra.mrb[0].mxu0 %vm391_vm2, %v344_v28  ;;  %v2399_v28 = vld [vmem:[#allocation2 + $0x8] sm:$0xff] }
  0x70   : > { %1739 = vmatprep.mubr.msk.f32.mxu0 %vm391_vm2, %v345_v29 }
  0x73   : > { %1740 = vmatmul.mubr.msk.f32.gmra.mrb[2].mxu0 %vm391_vm2, %v346_v30  ;;  %v383_v30 = vld [vmem:[%s2199_s14 + $0x40] sm:$0xff] }
  0x74   : > { %1742 = vmatprep.mubr.msk.f32.mxu0 %vm391_vm2, %v347_v31  ;;  %v384_v31 = vld [vmem:[%s2199_s14 + $0x48] sm:$0xff] }
  0x77   : > { %1743 = vmatmul.mubr.msk.f32.gmra.mrb[4].mxu0 %vm391_vm2, %v348_v32 }
  0x78   : > { %1745 = vmatprep.mubr.msk.f32.mxu0 %vm391_vm2, %v349_v33 }
  0x7b   : > { %1746 = vmatmul.mubr.msk.f32.gmra.mrb[6].mxu0 %vm391_vm2, %v350_v34  ;;  %v1880_v34 = vpack.c.bf16 %v384_v31, %v383_v30  ;;  %v662_v31 = vld [vmem:[#allocation2 + $0x68] sm:$0xff] }
  0x7c   : > { %1748 = vmatprep.mubr.msk.f32.mxu0 %vm391_vm2, %v351_v35 }
  0x7d   : > { %1881 = vmatprep.subr.bf16.mxu1 %v1880_v34 }
  0x7e   : > { %1883 = vmatpush3.bf16.msra.mxu1 %v1880_v34  ;;  %v2480_v34 = vld [vmem:[#allocation2 + $0x70] sm:$0xff] }
  0x7f   : > { %1749 = vmatmul.mubr.msk.f32.gmra.mrb[8].mxu0 %vm391_vm2, %v352_v36  ;;  %v2412_v36 = vld [vmem:[#allocation2 + $0x10] sm:$0xff] }
  0x80   : > { %1751 = vmatprep.mubr.msk.f32.mxu0 %vm391_vm2, %v353_v37  ;;  %v2416_v37 = vld [vmem:[#allocation2 + $0x20] sm:$0xff] }
  0x83   : > { %1752 = vmatmul.mubr.msk.f32.gmra.mrb[10].mxu0 %vm391_vm2, %v354_v38 }
  0x84   : > { %1754 = vmatprep.mubr.msk.f32.mxu0 %vm391_vm2, %v355_v39  ;;  %v385_v39 = vld [vmem:[%s2199_s14 + $0x50] sm:$0xff] }
  0x87   : > { %1755 = vmatmul.mubr.msk.f32.gmra.mrb[12].mxu0 %vm391_vm2, %v356_v40  ;;  %v386_v40 = vld [vmem:[%s2199_s14 + $0x58] sm:$0xff] }
  0x88   : > { %1757 = vmatprep.mubr.msk.f32.mxu0 %vm391_vm2, %v357_v41 }
  0x8b   : > { %1758 = vmatmul.mubr.msk.f32.gmra.mrb[14].mxu0 %vm391_vm2, %v358_v42 }
 0x142   : > { %v1738_v43 = vpop.f32.mrb[0].mxu0 }
 0x143   : > { %v554_v44 = vpop.f32.mrb[1].mxu0  ;;  %v2341_v49 = vmul.f32 0.125, %v1738_v43  ;;  %v1884_v43 = vpack.c.bf16 %v386_v40, %v385_v39 }
 0x144   : > { %v2336_v45 = vmul.f32 0.125, %v554_v44  ;;  %v2426_v44 = vld [vmem:[#allocation2 + $0x28] sm:$0xff] }
 0x145   : > { %1885 = vmatprep.subr.bf16.mxu1 %v1884_v43 }
 0x146   : > { %665 = vmax.xlane.f32.xlu0 %v2336_v45  ;;  %v1741_v46 = vpop.f32.mrb[2].mxu0  ;;  %1887 = vmatpush3.bf16.msra.mxu1 %v1884_v43 }
 0x147   : > { %v2339_v47 = vmul.f32 0.125, %v1741_v46  ;;  %v564_v48 = vpop.f32.mrb[3].mxu0 }
 0x148   : > { %v2344_v50 = vmul.f32 0.125, %v564_v48  ;;  %v2433_v48 = vld [vmem:[#allocation2 + $0x30] sm:$0xff] }
 0x149   : > { %671 = vmax.xlane.f32.xlu1 %v2339_v47 }
 0x14a   : > { %667 = vmax.xlane.f32.xlu0 %v2341_v49  ;;  %v1744_v51 = vpop.f32.mrb[4].mxu0 }
 0x14b   : > { %v574_v52 = vpop.f32.mrb[5].mxu0  ;;  %v2350_v54 = vmul.f32 0.125, %v1744_v51 }
 0x14c   : > { %v2347_v53 = vmul.f32 0.125, %v574_v52  ;;  %v387_v52 = vld [vmem:[%s2199_s14 + $0x60] sm:$0xff] }
 0x14d   : > { %669 = vmax.xlane.f32.xlu1 %v2344_v50 }
 0x14e   : > { %v1747_v55 = vpop.f32.mrb[6].mxu0  ;;  %673 = vmax.xlane.f32.xlu0 %v2347_v53 }
 0x14f   : > { %v584_v56 = vpop.f32.mrb[7].mxu0  ;;  %v2356_v58 = vmul.f32 0.125, %v1747_v55  ;;  %v388_v55 = vld [vmem:[%s2199_s14 + $0x68] sm:$0xff] }
 0x150   : > { %v2353_v57 = vmul.f32 0.125, %v584_v56 }
 0x151   : > { %675 = vmax.xlane.f32.xlu1 %v2350_v54 }
 0x152   : > { %v1750_v59 = vpop.f32.mrb[8].mxu0  ;;  %677 = vmax.xlane.f32.xlu0 %v2353_v57 }
 0x153   : > { %v594_v60 = vpop.f32.mrb[9].mxu0  ;;  %v2362_v62 = vmul.f32 0.125, %v1750_v59 }
 0x154   : > { %v2359_v61 = vmul.f32 0.125, %v594_v60  ;;  %v1888_v60 = vpack.c.bf16 %v388_v55, %v387_v52 }
 0x155   : > { %679 = vmax.xlane.f32.xlu1 %v2356_v58 }
 0x156   : > { %v1753_v0 = vpop.f32.mrb[10].mxu0  ;;  %681 = vmax.xlane.f32.xlu0 %v2359_v61  ;;  %1889 = vmatprep.subr.bf16.mxu1 %v1888_v60 }
 0x157   : > { %v604_v1 = vpop.f32.mrb[11].mxu0  ;;  %v2368_v3 = vmul.f32 0.125, %v1753_v0  ;;  %1891 = vmatpush3.bf16.msra.mxu1 %v1888_v60 }
 0x158   : > { %v2365_v2 = vmul.f32 0.125, %v604_v1  ;;  %v2447_v1 = vld [vmem:[#allocation2 + $0x40] sm:$0xff] }
 0x159   : > { %683 = vmax.xlane.f32.xlu1 %v2362_v62 }
 0x15a   : > { %v1756_v4 = vpop.f32.mrb[12].mxu0  ;;  %685 = vmax.xlane.f32.xlu0 %v2365_v2 }
 0x15b   : > { %v614_v5 = vpop.f32.mrb[13].mxu0  ;;  %v2374_v7 = vmul.f32 0.125, %v1756_v4 }
 0x15c   : > { %v2371_v6 = vmul.f32 0.125, %v614_v5  ;;  %v389_v5 = vld [vmem:[%s2199_s14 + $0x70] sm:$0xff] }
 0x15d   : > { %687 = vmax.xlane.f32.xlu1 %v2368_v3 }
 0x15e   : > { %v1759_v8 = vpop.f32.mrb[14].mxu0  ;;  %689 = vmax.xlane.f32.xlu0 %v2371_v6 }
 0x15f   : > { %v624_v9 = vpop.f32.mrb[15].mxu0  ;;  %v2380_v11 = vmul.f32 0.125, %v1759_v8  ;;  %v390_v8 = vld [vmem:[%s2199_s14 + $0x78] sm:$0xff] }
 0x160   : > { %v2377_v10 = vmul.f32 0.125, %v624_v9  ;;  %v1892_v13 = vpack.c.bf16 %v390_v8, %v389_v5 }
 0x161   : > { %691 = vmax.xlane.f32.xlu1 %v2374_v7 }
 0x162   : > { %693 = vmax.xlane.f32.xlu0 %v2377_v10  ;;  %1893 = vmatprep.subr.bf16.mxu1 %v1892_v13 }
 0x163   : > { %1895 = vmatpush3.bf16.msra.mxu1 %v1892_v13 }
 0x165   : > { %695 = vmax.xlane.f32.xlu1 %v2380_v11 }
 0x1d3   : > { %v666_v25 = vpop.xlane.xlu0 %665 }
 0x1d4   : > { %v2395_v26 = vmax.f32 %v2392_v24, %v666_v25 }
 0x1d6   : > { %1275 = vst.msk [vmem:[#allocation2] sm:$0xff] %vm969_vm4, %v2395_v26  ;;  %v672_v29 = vpop.xlane.xlu1 %671  ;;  %763 = vperm.xlu0 %1956, %v2395_v26   ;;  %v713_v17 = vsub.f32 %v2392_v24, %v2395_v26 }
 0x1d7   : > { %v2407_v32 = vmax.f32 %v2397_v27, %v672_v29  ;;  %v668_v33 = vpop.xlane.xlu0 %667 }
 0x1d8   : > { %v2410_v35 = vmax.f32 %v2399_v28, %v668_v33  ;;  %v729_v25 = vmul.f32 1.442695, %v713_v17 }
 0x1d9   : > { %1278 = vst.msk [vmem:[#allocation2 + $0x18] sm:$0xff] %vm969_vm4, %v2407_v32  ;;  %v716_v24 = vsub.f32 %v2397_v27, %v2407_v32 }
 0x1da   : > { %1276 = vst.msk [vmem:[#allocation2 + $0x8] sm:$0xff] %vm969_vm4, %v2410_v35  ;;  %v670_v38 = vpop.xlane.xlu1 %669  ;;  %768 = vperm.xlu1 %1957, %v2410_v35   ;;  %1958 = vpow2.f32 %v729_v25 }
 0x1db   : > { %v2424_v41 = vmax.f32 %v2412_v36, %v670_v38  ;;  %v674_v42 = vpop.xlane.xlu0 %673  ;;  %v735_v38 = vmul.f32 1.442695, %v716_v24 }
 0x1dc   : > { %v2429_v46 = vmax.f32 %v2416_v37, %v674_v42  ;;  %v2485_v42 = vld [vmem:[#allocation2 + $0x78] sm:$0xff] }
 0x1dd   : > { %1277 = vst.msk [vmem:[#allocation2 + $0x10] sm:$0xff] %vm969_vm4, %v2424_v41  ;;  %1960 = vpow2.f32 %v735_v38 }
 0x1de   : > { %v676_v51 = vpop.xlane.xlu1 %675  ;;  %778 = vperm.xlu1 %1957, %v2407_v32   ;;  %1279 = vst.msk [vmem:[#allocation2 + $0x20] sm:$0xff] %vm969_vm4, %v2429_v46  ;;  %v717_v13 = vsub.f32 %v2416_v37, %v2429_v46 }
 0x1df   : > { %v702_v56 = vmax.f32 %v2426_v44, %v676_v51  ;;  %v678_v59 = vpop.xlane.xlu0 %677 }
 0x1e0   : > { %v2444_v0 = vmax.f32 %v2433_v48, %v678_v59  ;;  %v737_v17 = vmul.f32 1.442695, %v717_v13 }
 0x1e1   : > { %1280 = vst.msk [vmem:[#allocation2 + $0x28] sm:$0xff] %vm969_vm4, %v702_v56  ;;  %v718_v27 = vsub.f32 %v2426_v44, %v702_v56 }
 0x1e2   : > { %v680_v4 = vpop.xlane.xlu1 %679  ;;  %773 = vperm.xlu1 %1957, %v2424_v41   ;;  %1281 = vst.msk [vmem:[#allocation2 + $0x30] sm:$0xff] %vm969_vm4, %v2444_v0 }
 0x1e3   : > { %v704_v9 = vmax.f32 %v2441_v63, %v680_v4  ;;  %v682_v12 = vpop.xlane.xlu0 %681  ;;  %v739_v51 = vmul.f32 1.442695, %v718_v27 }
 0x1e4   : > { %v2456_v15 = vmax.f32 %v2447_v1, %v682_v12 }
 0x1e5   : > { %1282 = vst.msk [vmem:[#allocation2 + $0x38] sm:$0xff] %vm969_vm4, %v704_v9  ;;  %v720_v52 = vsub.f32 %v2441_v63, %v704_v9  ;;  %1962 = vpow2.f32 %v739_v51 }
 0x1e6   : > { %v684_v18 = vpop.xlane.xlu1 %683  ;;  %788 = vperm.xlu1 %1957, %v702_v56   ;;  %1283 = vst.msk [vmem:[#allocation2 + $0x40] sm:$0xff] %vm969_vm4, %v2456_v15  ;;  %v714_v56 = vsub.f32 %v2399_v28, %v2410_v35  ;;  %v715_v28 = vsub.f32 %v2412_v36, %v2424_v41  ;;  %v2510_v35 = vpop.eup %1958 }
 0x1e7   : > { %v706_v19 = vmax.f32 %v658_v14, %v684_v18  ;;  %v686_v20 = vpop.xlane.xlu0 %685  ;;  %v743_v63 = vmul.f32 1.442695, %v720_v52  ;;  %v719_v18 = vsub.f32 %v2433_v48, %v2444_v0 }
 0x1e8   : > { %v2466_v22 = vmax.f32 %v2459_v16, %v686_v20  ;;  %v731_v5 = vmul.f32 1.442695, %v714_v56  ;;  %v733_v12 = vmul.f32 1.442695, %v715_v28  ;;  %v721_v20 = vsub.f32 %v2447_v1, %v2456_v15 }
 0x1e9   : > { %1284 = vst.msk [vmem:[#allocation2 + $0x48] sm:$0xff] %vm969_vm4, %v706_v19  ;;  %808 = vperm.xlu0 %1956, %v706_v19   ;;  %v722_v4 = vsub.f32 %v658_v14, %v706_v19  ;;  %1964 = vpow2.f32 %v743_v63  ;;  %v2516_v14 = vpop.eup %1960 }
 0x1ea   : > { %v688_v26 = vpop.xlane.xlu1 %687  ;;  %783 = vperm.xlu1 %1957, %v2429_v46   ;;  %1285 = vst.msk [vmem:[#allocation2 + $0x50] sm:$0xff] %vm969_vm4, %v2466_v22  ;;  %1966 = vpow2.f32 %v731_v5  ;;  %v741_v46 = vmul.f32 1.442695, %v719_v18  ;;  %v745_v48 = vmul.f32 1.442695, %v721_v20 }
 0x1eb   : > { %v708_v29 = vmax.f32 %v660_v21, %v688_v26  ;;  %v690_v30 = vpop.xlane.xlu0 %689  ;;  %v747_v8 = vmul.f32 1.442695, %v722_v4 }
 0x1ec   : > { %v2477_v33 = vmax.f32 %v2469_v23, %v690_v30 }
 0x1ed   : > { %1286 = vst.msk [vmem:[#allocation2 + $0x58] sm:$0xff] %vm969_vm4, %v708_v29  ;;  %818 = vperm.xlu0 %1956, %v708_v29   ;;  %1968 = vpow2.f32 %v747_v8 }
 0x1ee   : > { %v692_v32 = vpop.xlane.xlu1 %691  ;;  %798 = vperm.xlu1 %1957, %v704_v9   ;;  %1287 = vst.msk [vmem:[#allocation2 + $0x60] sm:$0xff] %vm969_vm4, %v2477_v33  ;;  %v724_v9 = vsub.f32 %v660_v21, %v708_v29  ;;  %1970 = vpow2.f32 %v733_v12 }
 0x1ef   : > { %v710_v39 = vmax.f32 %v662_v31, %v692_v32  ;;  %v694_v40 = vpop.xlane.xlu0 %693  ;;  %v2522_v19 = vpop.eup %1962 }
 0x1f0   : > { %v2488_v43 = vmax.f32 %v2480_v34, %v694_v40  ;;  %v751_v36 = vmul.f32 1.442695, %v724_v9 }
 0x1f1   : > { %1288 = vst.msk [vmem:[#allocation2 + $0x68] sm:$0xff] %vm969_vm4, %v710_v39  ;;  %828 = vperm.xlu0 %1956, %v710_v39   ;;  %v726_v41 = vsub.f32 %v662_v31, %v710_v39 }
 0x1f2   : > { %793 = vperm.xlu1 %1957, %v2444_v0   ;;  %v696_v44 = vpop.xlane.xlu1 %695  ;;  %v727_v55 = vsub.f32 %v2480_v34, %v2488_v43  ;;  %1289 = vst.msk [vmem:[#allocation2 + $0x70] sm:$0xff] %vm969_vm4, %v2488_v43  ;;  %1972 = vpow2.f32 %v751_v36  ;;  %v723_v0 = vsub.f32 %v2459_v16, %v2466_v22 }
 0x1f3   : > { %v2500_v59 = vmax.f32 %v2485_v42, %v696_v44  ;;  %v755_v37 = vmul.f32 1.442695, %v726_v41  ;;  %1974 = vpow2.f32 %v737_v17  ;;  %v2528_v21 = vpop.eup %1964 }
 0x1f4   : > { %v2530_v25 = vpop.eup %1966  ;;  %v749_v1 = vmul.f32 1.442695, %v723_v0 }
 0x1f5   : > { %v728_v60 = vsub.f32 %v2485_v42, %v2500_v59  ;;  %1290 = vst.msk [vmem:[#allocation2 + $0x78] sm:$0xff] %vm969_vm4, %v2500_v59  ;;  %838 = vperm.xlu0 %1956, %v2500_v59   ;;  %1976 = vpow2.f32 %v755_v37 }
 0x1f6   : > { %803 = vperm.xlu1 %1957, %v2456_v15   ;;  %1978 = vpow2.f32 %v741_v46  ;;  %v725_v15 = vsub.f32 %v2469_v23, %v2477_v33 }
 0x1f7   : > { %v2536_v24 = vpop.eup %1968  ;;  %1980 = vpow2.f32 %v745_v48 }
 0x1f8   : > { %v2538_v26 = vpop.eup %1970  ;;  %1982 = vpow2.f32 %v749_v1  ;;  %v753_v16 = vmul.f32 1.442695, %v725_v15 }
 0x1f9   : > { %1004 = vperm.xlu0 %1956, %v2510_v35  }
 0x1fa   : > { %813 = vperm.xlu1 %1957, %v2466_v22   ;;  %1984 = vpow2.f32 %v753_v16 }
 0x1fc   : > { %v2544_v29 = vpop.eup %1972 }
 0x1fd   : > { %1019 = vperm.xlu0 %1956, %v2516_v14   ;;  %v2546_v30 = vpop.eup %1974 }
 0x1fe   : > { %823 = vperm.xlu1 %1957, %v2477_v33  }
 0x1ff   : > { %v2550_v22 = vpop.eup %1976 }
 0x200   : > { %v2552_v31 = vpop.eup %1978 }
 0x201   : > { %1029 = vperm.xlu0 %1956, %v2522_v19   ;;  %v2556_v23 = vpop.eup %1980 }
 0x202   : > { %833 = vperm.xlu1 %1957, %v2488_v43   ;;  %v2559_v33 = vpop.eup %1982 }
 0x204   : > { %v2562_v38 = vpop.eup %1984 }
 0x205   : > { %1039 = vperm.xlu0 %1956, %v2528_v21  }
 0x206   : > { %1009 = vperm.xlu1 %1957, %v2530_v25  }
 0x209   : > { %1049 = vperm.xlu0 %1956, %v2536_v24  }
 0x20a   : > { %1014 = vperm.xlu1 %1957, %v2538_v26  }
 0x20d   : > { %1059 = vperm.xlu0 %1956, %v2544_v29  }
 0x20e   : > { %1024 = vperm.xlu1 %1957, %v2546_v30  }
 0x211   : > { %1069 = vperm.xlu0 %1956, %v2550_v22  }
 0x212   : > { %1034 = vperm.xlu1 %1957, %v2552_v31  }
 0x216   : > { %1044 = vperm.xlu1 %1957, %v2556_v23  }
 0x21a   : > { %1054 = vperm.xlu1 %1957, %v2559_v33  }
 0x21e   : > { %1064 = vperm.xlu1 %1957, %v2562_v38  }
 0x255   : > { %v764_v27 = vpop.permute.xlu0 %763 }
 0x256   : > { %v841_v32 = vsub.f32 %v2336_v45, %v764_v27 }
 0x258   : > { %v857_v39 = vmul.f32 1.442695, %v841_v32 }
 0x259   : > { %v769_v40 = vpop.permute.xlu1 %768 }
 0x25a   : > { %1986 = vpow2.f32 %v857_v39  ;;  %v842_v51 = vsub.f32 %v2341_v49, %v769_v40 }
 0x25c   : > { %v859_v52 = vmul.f32 1.442695, %v842_v51 }
 0x25d   : > { %v779_v44 = vpop.permute.xlu1 %778 }
 0x25e   : > { %1988 = vpow2.f32 %v859_v52  ;;  %v844_v56 = vsub.f32 %v2339_v47, %v779_v44 }
 0x260   : > { %v863_v63 = vmul.f32 1.442695, %v844_v56 }
 0x261   : > { %v774_v4 = vpop.permute.xlu1 %773 }
 0x262   : > { %1990 = vpow2.f32 %v863_v63  ;;  %v843_v5 = vsub.f32 %v2344_v50, %v774_v4 }
 0x264   : > { %v1987_v28 = vpop.eup %1986  ;;  %v861_v8 = vmul.f32 1.442695, %v843_v5 }
 0x265   : > { %v789_v9 = vpop.permute.xlu1 %788  ;;  %921 = vadd.xlane.f32.xlu1 %v1987_v28  ;;  %1792 = vmatprep.mubr.f32.mxu1 %v1987_v28 }
 0x266   : > { %1992 = vpow2.f32 %v861_v8  ;;  %v846_v45 = vsub.f32 %v2350_v54, %v789_v9 }
 0x268   : > { %v1989_v12 = vpop.eup %1988  ;;  %v867_v49 = vmul.f32 1.442695, %v846_v45  ;;  %v809_v13 = vpop.permute.xlu0 %808 }
 0x269   : > { %v784_v36 = vpop.permute.xlu1 %783  ;;  %923 = vadd.xlane.f32.xlu0 %v1989_v12  ;;  %1793 = vmatmul.mubr.f32.vlgmr.msra.gmra.mrb[0].mxu1 %v1989_v12  ;;  %v850_v46 = vsub.f32 %v2362_v62, %v809_v13 }
 0x26a   : > { %1994 = vpow2.f32 %v867_v49  ;;  %v845_v47 = vsub.f32 %v2347_v53, %v784_v36 }
 0x26b   : > { %v875_v53 = vmul.f32 1.442695, %v850_v46 }
 0x26c   : > { %v1991_v41 = vpop.eup %1990  ;;  %v865_v17 = vmul.f32 1.442695, %v845_v47  ;;  %v819_v50 = vpop.permute.xlu0 %818 }
 0x26d   : > { %v799_v18 = vpop.permute.xlu1 %798  ;;  %927 = vadd.xlane.f32.xlu1 %v1991_v41  ;;  %v852_v15 = vsub.f32 %v2368_v3, %v819_v50 }
 0x26e   : > { %1996 = vpow2.f32 %v865_v17  ;;  %v848_v37 = vsub.f32 %v2356_v58, %v799_v18  ;;  %v759_v17 = vmul.f32 1.442695, %v728_v60 }
 0x26f   : > { %v879_v62 = vmul.f32 1.442695, %v852_v15 }
 0x270   : > { %v1993_v54 = vpop.eup %1992  ;;  %v871_v20 = vmul.f32 1.442695, %v848_v37  ;;  %v829_v0 = vpop.permute.xlu0 %828 }
 0x271   : > { %v794_v48 = vpop.permute.xlu1 %793  ;;  %925 = vadd.xlane.f32.xlu0 %v1993_v54  ;;  %1795 = vmatprep.mubr.f32.mxu1 %v1993_v54  ;;  %v854_v39 = vsub.f32 %v2374_v7, %v829_v0 }
 0x272   : > { %1998 = vpow2.f32 %v871_v20  ;;  %v847_v1 = vsub.f32 %v2353_v57, %v794_v48  ;;  %1796 = vmatmul.mubr.f32.gmra.mrb[2].mxu1 %v1991_v41  ;;  %v757_v41 = vmul.f32 1.442695, %v727_v55 }
 0x273   : > { %v883_v3 = vmul.f32 1.442695, %v854_v39 }
 0x274   : > { %v1995_v16 = vpop.eup %1994  ;;  %v869_v27 = vmul.f32 1.442695, %v847_v1  ;;  %v839_v51 = vpop.permute.xlu0 %838 }
 0x275   : > { %v804_v32 = vpop.permute.xlu1 %803  ;;  %931 = vadd.xlane.f32.xlu1 %v1995_v16  ;;  %v856_v56 = vsub.f32 %v2380_v11, %v839_v51 }
 0x276   : > { %2000 = vpow2.f32 %v869_v27  ;;  %v849_v58 = vsub.f32 %v2359_v61, %v804_v32  ;;  %v890_v32 = vld [vmem:[#allocation3 + $0x8] sm:$0xff] }
 0x277   : > { %2002 = vpow2.f32 %v875_v53  ;;  %v887_v5 = vmul.f32 1.442695, %v856_v56  ;;  %v889_v53 = vld [vmem:[#allocation3] sm:$0xff] }
 0x278   : > { %v1997_v40 = vpop.eup %1996  ;;  %v873_v52 = vmul.f32 1.442695, %v849_v58  ;;  %v2595_v34 = vpop.permute.xlu0 %1004  ;;  %v905_v15 = vmul.f32 %v2510_v35, %v889_v53  ;;  %v899_v53 = vld [vmem:[#allocation3 + $0x50] sm:$0xff] }
 0x279   : > { %v814_v44 = vpop.permute.xlu1 %813  ;;  %929 = vadd.xlane.f32.xlu0 %v1997_v40  ;;  %1798 = vmatprep.mubr.f32.mxu1 %v1997_v40  ;;  %v892_v40 = vld [vmem:[#allocation3 + $0x18] sm:$0xff] }
 0x27a   : > { %2004 = vpow2.f32 %v873_v52  ;;  %v851_v57 = vsub.f32 %v2365_v2, %v814_v44  ;;  %1799 = vmatmul.mubr.f32.gmra.mrb[4].mxu1 %v1995_v16  ;;  %v908_v52 = vmul.f32 %v2516_v14, %v892_v40 }
 0x27b   : > { %2006 = vpow2.f32 %v879_v62  ;;  %v906_v62 = vmul.f32 %v2530_v25, %v890_v32  ;;  %v915_v32 = vmul.f32 %v2559_v33, %v899_v53  ;;  %v903_v33 = vld [vmem:[#allocation3 + $0x70] sm:$0xff] }
 0x27c   : > { %v1999_v63 = vpop.eup %1998  ;;  %v877_v61 = vmul.f32 1.442695, %v851_v57  ;;  %v2599_v55 = vpop.permute.xlu0 %1019  ;;  %v891_v57 = vld [vmem:[#allocation3 + $0x10] sm:$0xff] }
 0x27d   : > { %v824_v4 = vpop.permute.xlu1 %823  ;;  %935 = vadd.xlane.f32.xlu1 %v1999_v63  ;;  %v907_v35 = vmul.f32 %v2538_v26, %v891_v57 }
 0x27e   : > { %2008 = vpow2.f32 %v877_v61  ;;  %v853_v7 = vsub.f32 %v2371_v6, %v824_v4 }
 0x27f   : > { %2010 = vpow2.f32 %v883_v3 }
 0x280   : > { %v2001_v28 = vpop.eup %2000  ;;  %v881_v8 = vmul.f32 1.442695, %v853_v7  ;;  %v2603_v42 = vpop.permute.xlu0 %1029  ;;  %v893_v7 = vld [vmem:[#allocation3 + $0x20] sm:$0xff] }
 0x281   : > { %v2003_v9 = vpop.eup %2002  ;;  %933 = vadd.xlane.f32.xlu0 %v2001_v28  ;;  %v834_v45 = vpop.permute.xlu1 %833  ;;  %1801 = vmatprep.mubr.f32.mxu1 %v2001_v28  ;;  %v909_v14 = vmul.f32 %v2546_v30, %v893_v7 }
 0x282   : > { %2012 = vpow2.f32 %v881_v8  ;;  %v855_v2 = vsub.f32 %v2377_v10, %v834_v45  ;;  %939 = vadd.xlane.f32.xlu1 %v2003_v9  ;;  %1802 = vmatmul.mubr.f32.gmra.mrb[6].mxu1 %v1999_v63  ;;  %v894_v63 = vld [vmem:[#allocation3 + $0x28] sm:$0xff]  ;;  %v896_v8 = vld [vmem:[#allocation3 + $0x38] sm:$0xff] }
 0x283   : > { %2014 = vpow2.f32 %v887_v5  ;;  %v910_v25 = vmul.f32 %v2522_v19, %v894_v63  ;;  %v912_v26 = vmul.f32 %v2528_v21, %v896_v8  ;;  %v988_v8 = vld [vmem:[#allocation4 + $0x10] sm:$0xff] }
 0x284   : > { %v2005_v11 = vpop.eup %2004  ;;  %v885_v12 = vmul.f32 1.442695, %v855_v2  ;;  %v2607_v60 = vpop.permute.xlu0 %1039  ;;  %v895_v2 = vld [vmem:[#allocation3 + $0x30] sm:$0xff] }
 0x285   : > { %v2007_v49 = vpop.eup %2006  ;;  %937 = vadd.xlane.f32.xlu0 %v2005_v11  ;;  %1804 = vmatprep.mubr.f32.mxu1 %v2005_v11  ;;  %v2593_v37 = vpop.permute.xlu1 %1009  ;;  %v911_v19 = vmul.f32 %v2552_v31, %v895_v2 }
 0x286   : > { %2016 = vpow2.f32 %v885_v12  ;;  %943 = vadd.xlane.f32.xlu1 %v2007_v49  ;;  %1805 = vmatmul.mubr.f32.gmra.mrb[8].mxu1 %v2003_v9  ;;  %v898_v12 = vld [vmem:[#allocation3 + $0x48] sm:$0xff] }
 0x287   : > { %2018 = vpow2.f32 %v757_v41 }
 0x288   : > { %v2009_v6 = vpop.eup %2008  ;;  %2020 = vpow2.f32 %v759_v17  ;;  %v2611_v20 = vpop.permute.xlu0 %1049 }
 0x289   : > { %v2011_v13 = vpop.eup %2010  ;;  %941 = vadd.xlane.f32.xlu0 %v2009_v6  ;;  %1807 = vmatprep.mubr.f32.mxu1 %v2009_v6  ;;  %v2597_v43 = vpop.permute.xlu1 %1014 }
 0x28a   : > { %947 = vadd.xlane.f32.xlu1 %v2011_v13  ;;  %1808 = vmatmul.mubr.f32.gmra.mrb[10].mxu1 %v2007_v49  ;;  %v914_v49 = vmul.f32 %v2536_v24, %v898_v12  ;;  %v990_v12 = vld [vmem:[#allocation4 + $0x20] sm:$0xff] }
 0x28c   : > { %v2013_v36 = vpop.eup %2012  ;;  %v2615_v0 = vpop.permute.xlu0 %1059 }
 0x28d   : > { %v2015_v47 = vpop.eup %2014  ;;  %945 = vadd.xlane.f32.xlu0 %v2013_v36  ;;  %1810 = vmatprep.mubr.f32.mxu1 %v2013_v36  ;;  %v2601_v46 = vpop.permute.xlu1 %1024 }
 0x28e   : > { %951 = vadd.xlane.f32.xlu1 %v2015_v47  ;;  %1811 = vmatmul.mubr.f32.gmra.mrb[12].mxu1 %v2011_v13  ;;  %v897_v13 = vld [vmem:[#allocation3 + $0x40] sm:$0xff] }
 0x28f   : > { %v913_v21 = vmul.f32 %v2556_v23, %v897_v13  ;;  %v901_v23 = vld [vmem:[#allocation3 + $0x60] sm:$0xff] }
 0x290   : > { %v2017_v10 = vpop.eup %2016  ;;  %v2620_v16 = vpop.permute.xlu0 %1069 }
 0x291   : > { %949 = vadd.xlane.f32.xlu0 %v2017_v10  ;;  %1813 = vmatprep.mubr.f32.mxu1 %v2017_v10  ;;  %v2587_v50 = vpop.eup %2018  ;;  %v2605_v59 = vpop.permute.xlu1 %1034 }
 0x292   : > { %1814 = vmatmul.mubr.f32.gmra.mrb[14].mxu1 %v2015_v47  ;;  %v2590_v18 = vpop.eup %2020  ;;  %v900_v47 = vld [vmem:[#allocation3 + $0x58] sm:$0xff] }
 0x293   : > { %v916_v41 = vmul.f32 %v2544_v29, %v900_v47 }
 0x295   : > { %v2609_v54 = vpop.permute.xlu1 %1044 }
 0x299   : > { %v2613_v48 = vpop.permute.xlu1 %1054 }
 0x29d   : > { %v2617_v1 = vpop.permute.xlu1 %1064 }
 0x29f   : > { %1074 = vperm.xlu1 %1957, %v2587_v50  }
 0x2a7   : > { %1079 = vperm.xlu0 %1956, %v2590_v18  }
 0x2f2   : > { %v922_v27 = vpop.xlane.xlu1 %921 }
 0x2f3   : > { %v953_v58 = vadd.f32 %v922_v27, %v905_v15  ;;  %v902_v27 = vld [vmem:[#allocation3 + $0x68] sm:$0xff] }
 0x2f5   : > { %970 = vst.msk [vmem:[#allocation3] sm:$0xff] %vm969_vm4, %v953_v58  ;;  %v918_v58 = vmul.f32 %v2550_v22, %v902_v27  ;;  %v919_v22 = vmul.f32 %v2587_v50, %v903_v33  ;;  %v989_v50 = vld [vmem:[#allocation4 + $0x18] sm:$0xff] }
 0x2f6   : > { %v924_v39 = vpop.xlane.xlu0 %923 }
 0x2f7   : > { %v954_v51 = vadd.f32 %v924_v39, %v906_v62 }
 0x2f9   : > { %971 = vst.msk [vmem:[#allocation3 + $0x8] sm:$0xff] %vm969_vm4, %v954_v51  ;;  %v904_v51 = vld [vmem:[#allocation3 + $0x78] sm:$0xff] }
 0x2fa   : > { %v928_v44 = vpop.xlane.xlu1 %927 }
 0x2fb   : > { %v956_v3 = vadd.f32 %v928_v44, %v908_v52  ;;  %v917_v52 = vmul.f32 %v2562_v38, %v901_v23  ;;  %v920_v44 = vmul.f32 %v2590_v18, %v904_v51  ;;  %v987_v38 = vld [vmem:[#allocation4 + $0x8] sm:$0xff] }
 0x2fc   : > { %v999_v23 = vld [vmem:[#allocation4 + $0x68] sm:$0xff] }
 0x2fd   : > { %973 = vst.msk [vmem:[#allocation3 + $0x18] sm:$0xff] %vm969_vm4, %v956_v3 }
 0x2fe   : > { %v926_v56 = vpop.xlane.xlu0 %925 }
 0x2ff   : > { %v955_v61 = vadd.f32 %v926_v56, %v907_v35 }
 0x301   : > { %972 = vst.msk [vmem:[#allocation3 + $0x10] sm:$0xff] %vm969_vm4, %v955_v61 }
 0x302   : > { %v932_v4 = vpop.xlane.xlu1 %931 }
 0x303   : > { %v958_v5 = vadd.f32 %v932_v4, %v910_v25  ;;  %v986_v25 = vld [vmem:[#allocation4] sm:$0xff]  ;;  %v1083_v4 = vmul.f32 %v2593_v37, %v987_v38 }
 0x304   : > { %v1082_v18 = vmul.f32 %v2595_v34, %v986_v25  ;;  %v991_v34 = vld [vmem:[#allocation4 + $0x28] sm:$0xff] }
 0x305   : > { %975 = vst.msk [vmem:[#allocation3 + $0x28] sm:$0xff] %vm969_vm4, %v958_v5 }
 0x306   : > { %v930_v28 = vpop.xlane.xlu0 %929 }
 0x307   : > { %v957_v9 = vadd.f32 %v930_v28, %v909_v14 }
 0x309   : > { %974 = vst.msk [vmem:[#allocation3 + $0x20] sm:$0xff] %vm969_vm4, %v957_v9  ;;  %v1085_v9 = vmul.f32 %v2599_v55, %v989_v50 }
 0x30a   : > { %v936_v45 = vpop.xlane.xlu1 %935 }
 0x30b   : > { %v960_v11 = vadd.f32 %v936_v45, %v912_v26  ;;  %v1084_v26 = vmul.f32 %v2597_v43, %v988_v8  ;;  %v993_v43 = vld [vmem:[#allocation4 + $0x38] sm:$0xff] }
 0x30c   : > { %v1089_v47 = vmul.f32 %v2607_v60, %v993_v43 }
 0x30d   : > { %977 = vst.msk [vmem:[#allocation3 + $0x38] sm:$0xff] %vm969_vm4, %v960_v11 }
 0x30e   : > { %v934_v6 = vpop.xlane.xlu0 %933 }
 0x30f   : > { %v940_v30 = vpop.xlane.xlu1 %939  ;;  %v959_v36 = vadd.f32 %v934_v6, %v911_v19  ;;  %v1087_v19 = vmul.f32 %v2603_v42, %v991_v34 }
 0x310   : > { %v962_v10 = vadd.f32 %v940_v30, %v914_v49  ;;  %v1086_v49 = vmul.f32 %v2601_v46, %v990_v12  ;;  %v1315_v50 = vld [vmem:[#allocation3 + $0x20] sm:$0xff] (!%p1637_p10) }
 0x311   : > { %976 = vst.msk [vmem:[#allocation3 + $0x30] sm:$0xff] %vm969_vm4, %v959_v36  ;;  %v992_v36 = vld [vmem:[#allocation4 + $0x30] sm:$0xff] }
 0x312   : > { %979 = vst.msk [vmem:[#allocation3 + $0x48] sm:$0xff] %vm969_vm4, %v962_v10  ;;  %v938_v17 = vpop.xlane.xlu0 %937  ;;  %v995_v10 = vld [vmem:[#allocation4 + $0x48] sm:$0xff] }
 0x313   : > { %v944_v15 = vpop.xlane.xlu1 %943  ;;  %v961_v31 = vadd.f32 %v938_v17, %v913_v21  ;;  %v1088_v21 = vmul.f32 %v2605_v59, %v992_v36  ;;  %v994_v17 = vld [vmem:[#allocation4 + $0x40] sm:$0xff] }
 0x314   : > { %v964_v24 = vadd.f32 %v944_v15, %v916_v41  ;;  %v1091_v15 = vmul.f32 %v2611_v20, %v995_v10  ;;  %v1090_v27 = vmul.f32 %v2609_v54, %v994_v17  ;;  %v1318_v8 = vld [vmem:[#allocation3 + $0x38] sm:$0xff] (!%p1637_p10) }
 0x315   : > { %978 = vst.msk [vmem:[#allocation3 + $0x40] sm:$0xff] %vm969_vm4, %v961_v31  ;;  %v997_v31 = vld [vmem:[#allocation4 + $0x58] sm:$0xff] }
 0x316   : > { %981 = vst.msk [vmem:[#allocation3 + $0x58] sm:$0xff] %vm969_vm4, %v964_v24  ;;  %v942_v62 = vpop.xlane.xlu0 %941  ;;  %v1093_v59 = vmul.f32 %v2615_v0, %v997_v31 }
 0x317   : > { %v948_v39 = vpop.xlane.xlu1 %947  ;;  %v963_v40 = vadd.f32 %v942_v62, %v915_v32  ;;  %v996_v32 = vld [vmem:[#allocation4 + $0x50] sm:$0xff] }
 0x318   : > { %v966_v29 = vadd.f32 %v948_v39, %v918_v58  ;;  %v1092_v39 = vmul.f32 %v2613_v48, %v996_v32 }
 0x319   : > { %980 = vst.msk [vmem:[#allocation3 + $0x50] sm:$0xff] %vm969_vm4, %v963_v40  ;;  %v998_v40 = vld [vmem:[#allocation4 + $0x60] sm:$0xff] }
 0x31a   : > { %983 = vst.msk [vmem:[#allocation3 + $0x68] sm:$0xff] %vm969_vm4, %v966_v29  ;;  %v946_v57 = vpop.xlane.xlu0 %945 }
 0x31b   : > { %v952_v3 = vpop.xlane.xlu1 %951  ;;  %v965_v35 = vadd.f32 %v946_v57, %v917_v52  ;;  %v1095_v52 = vmul.f32 %v2620_v16, %v999_v23  ;;  %v1001_v57 = vld [vmem:[#allocation4 + $0x78] sm:$0xff] }
 0x31c   : > { %v968_v56 = vadd.f32 %v952_v3, %v920_v44  ;;  %v1094_v44 = vmul.f32 %v2617_v1, %v998_v40  ;;  %v1000_v3 = vld [vmem:[#allocation4 + $0x70] sm:$0xff] }
 0x31d   : > { %982 = vst.msk [vmem:[#allocation3 + $0x60] sm:$0xff] %vm969_vm4, %v965_v35 }
 0x31e   : > { %985 = vst.msk [vmem:[#allocation3 + $0x78] sm:$0xff] %vm969_vm4, %v968_v56  ;;  %v950_v63 = vpop.xlane.xlu0 %949 }
 0x31f   : > { %v967_v61 = vadd.f32 %v950_v63, %v919_v22  ;;  %v1075_v48 = vpop.permute.xlu1 %1074 }
 0x321   : > { %984 = vst.msk [vmem:[#allocation3 + $0x70] sm:$0xff] %vm969_vm4, %v967_v61  ;;  %v1096_v61 = vmul.f32 %v1075_v48, %v1000_v3 }
 0x324   : > { %v1323_v34 = vld [vmem:[#allocation3 + $0x60] sm:$0xff] (!%p1637_p10) }
 0x325   : > { %v1326_v12 = vld [vmem:[#allocation3 + $0x78] sm:$0xff] (!%p1637_p10) }
 0x326   : > { %v1080_v0 = vpop.permute.xlu0 %1079 }
 0x327   : > { %v1097_v63 = vmul.f32 %v1080_v0, %v1001_v57 }
 0x33c   : > { %v1794_v7 = vpop.f32.mrb[0].mxu1 }
 0x33d   : > { %v1244_v5 = vadd.f32 %v1794_v7, %v1083_v4  ;;  %v1164_v14 = vpop.f32.mrb[1].mxu1  ;;  %v1313_v4 = vld [vmem:[#allocation3 + $0x10] sm:$0xff] (!%p1637_p10)  ;;  %v2115_v7 = vmov (!%p1637_p10), 0  }
 0x33e   : > { %v1243_v28 = vadd.f32 %v1164_v14, %v1082_v18  ;;  %v1311_v18 = vld [vmem:[#allocation3] sm:$0xff] (!%p1637_p10)  ;;  %2023 = vset.pattern.permute.xlu1 (!%p1637_p10), %v2115_v7  ;;  %2022 = vset.pattern.permute.xlu0 (!%p1637_p10), %v2115_v7  ;;  %v1312_v14 = vld [vmem:[#allocation3 + $0x8] sm:$0xff] (!%p1637_p10) }
 0x33f   : > { %1260 = vst.msk [vmem:[#allocation4 + $0x8] sm:$0xff] %vm391_vm2, %v1244_v5  ;;  %1339 = vperm.xlu1 (!%p1637_p10), %2023, %v1313_v4   ;;  %1329 = vperm.xlu0 (!%p1637_p10), %2022, %v1311_v18   ;;  %v1314_v5 = vld [vmem:[#allocation3 + $0x18] sm:$0xff] (!%p1637_p10) }
 0x340   : > { %1259 = vst.msk [vmem:[#allocation4] sm:$0xff] %vm391_vm2, %v1243_v28  ;;  %v1316_v28 = vld [vmem:[#allocation3 + $0x28] sm:$0xff] (!%p1637_p10) }
 0x343   : > { %1344 = vperm.xlu1 (!%p1637_p10), %2023, %v1314_v5   ;;  %1334 = vperm.xlu0 (!%p1637_p10), %2022, %v1312_v14  }
 0x345   : > { %v1797_v45 = vpop.f32.mrb[2].mxu1 }
 0x346   : > { %v1246_v2 = vadd.f32 %v1797_v45, %v1085_v9  ;;  %v1174_v11 = vpop.f32.mrb[3].mxu1  ;;  %v1317_v9 = vld [vmem:[#allocation3 + $0x30] sm:$0xff] (!%p1637_p10)  ;;  %v1319_v45 = vld [vmem:[#allocation3 + $0x40] sm:$0xff] (!%p1637_p10) }
 0x347   : > { %v1245_v37 = vadd.f32 %v1174_v11, %v1084_v26  ;;  %1354 = vperm.xlu1 (!%p1637_p10), %2023, %v1316_v28   ;;  %1349 = vperm.xlu0 (!%p1637_p10), %2022, %v1315_v50   ;;  %v1320_v26 = vld [vmem:[#allocation3 + $0x48] sm:$0xff] (!%p1637_p10)  ;;  %v1321_v11 = vld [vmem:[#allocation3 + $0x50] sm:$0xff] (!%p1637_p10) }
 0x348   : > { %1262 = vst.msk [vmem:[#allocation4 + $0x18] sm:$0xff] %vm391_vm2, %v1246_v2  ;;  %v1322_v2 = vld [vmem:[#allocation3 + $0x58] sm:$0xff] (!%p1637_p10) }
 0x349   : > { %1261 = vst.msk [vmem:[#allocation4 + $0x10] sm:$0xff] %vm391_vm2, %v1245_v37  ;;  %v1324_v37 = vld [vmem:[#allocation3 + $0x68] sm:$0xff] (!%p1637_p10) }
 0x34b   : > { %1364 = vperm.xlu1 (!%p1637_p10), %2023, %v1318_v8   ;;  %1359 = vperm.xlu0 (!%p1637_p10), %2022, %v1317_v9  }
 0x34d   : > { %v1800_v6 = vpop.f32.mrb[4].mxu1 }
 0x34e   : > { %v1248_v13 = vadd.f32 %v1800_v6, %v1087_v19  ;;  %v1184_v30 = vpop.f32.mrb[5].mxu1  ;;  %v1325_v19 = vld [vmem:[#allocation3 + $0x70] sm:$0xff] (!%p1637_p10) }
 0x34f   : > { %v1247_v55 = vadd.f32 %v1184_v30, %v1086_v49  ;;  %1374 = vperm.xlu1 (!%p1637_p10), %2023, %v1320_v26   ;;  %1369 = vperm.xlu0 (!%p1637_p10), %2022, %v1319_v45  }
 0x350   : > { %1264 = vst.msk [vmem:[#allocation4 + $0x28] sm:$0xff] %vm391_vm2, %v1248_v13  ;;  %v1297_v36 = vld [vmem:[#allocation4 + $0x10] sm:$0xff] (!%p1637_p10) }
 0x351   : > { %1263 = vst.msk [vmem:[#allocation4 + $0x20] sm:$0xff] %vm391_vm2, %v1247_v55 }
 0x353   : > { %1384 = vperm.xlu1 (!%p1637_p10), %2023, %v1322_v2   ;;  %1379 = vperm.xlu0 (!%p1637_p10), %2022, %v1321_v11  }
 0x355   : > { %v1803_v41 = vpop.f32.mrb[6].mxu1 }
 0x356   : > { %v1250_v42 = vadd.f32 %v1803_v41, %v1089_v47  ;;  %v1194_v53 = vpop.f32.mrb[7].mxu1  ;;  %v1295_v47 = vld [vmem:[#allocation4] sm:$0xff] (!%p1637_p10) }
 0x357   : > { %v1249_v46 = vadd.f32 %v1194_v53, %v1088_v21  ;;  %1394 = vperm.xlu1 (!%p1637_p10), %2023, %v1324_v37   ;;  %1389 = vperm.xlu0 (!%p1637_p10), %2022, %v1323_v34  }
 0x358   : > { %1266 = vst.msk [vmem:[#allocation4 + $0x38] sm:$0xff] %vm391_vm2, %v1250_v42 }
 0x359   : > { %1265 = vst.msk [vmem:[#allocation4 + $0x30] sm:$0xff] %vm391_vm2, %v1249_v46  ;;  %v1806_v24 = vpop.f32.mrb[8].mxu1  ;;  %v1298_v46 = vld [vmem:[#allocation4 + $0x18] sm:$0xff] (!%p1637_p10) }
 0x35a   : > { %v1252_v60 = vadd.f32 %v1806_v24, %v1091_v15  ;;  %v1204_v58 = vpop.f32.mrb[9].mxu1  ;;  %v1296_v15 = vld [vmem:[#allocation4 + $0x8] sm:$0xff] (!%p1637_p10) }
 0x35b   : > { %v1251_v62 = vadd.f32 %v1204_v58, %v1090_v27  ;;  %1404 = vperm.xlu1 (!%p1637_p10), %2023, %v1326_v12   ;;  %1399 = vperm.xlu0 (!%p1637_p10), %2022, %v1325_v19  }
 0x35c   : > { %1268 = vst.msk [vmem:[#allocation4 + $0x48] sm:$0xff] %vm391_vm2, %v1252_v60 }
 0x35d   : > { %1267 = vst.msk [vmem:[#allocation4 + $0x40] sm:$0xff] %vm391_vm2, %v1251_v62  ;;  %v1809_v20 = vpop.f32.mrb[10].mxu1  ;;  %v1300_v62 = vld [vmem:[#allocation4 + $0x28] sm:$0xff] (!%p1637_p10) }
 0x35e   : > { %v1254_v51 = vadd.f32 %v1809_v20, %v1093_v59  ;;  %v1214_v54 = vpop.f32.mrb[11].mxu1  ;;  %v1299_v59 = vld [vmem:[#allocation4 + $0x20] sm:$0xff] (!%p1637_p10) }
 0x35f   : > { %v1253_v29 = vadd.f32 %v1214_v54, %v1092_v39 }
 0x360   : > { %1270 = vst.msk [vmem:[#allocation4 + $0x58] sm:$0xff] %vm391_vm2, %v1254_v51 }
 0x361   : > { %1269 = vst.msk [vmem:[#allocation4 + $0x50] sm:$0xff] %vm391_vm2, %v1253_v29  ;;  %v1812_v33 = vpop.f32.mrb[12].mxu1  ;;  %v1302_v29 = vld [vmem:[#allocation4 + $0x38] sm:$0xff] (!%p1637_p10) }
 0x362   : > { %v1256_v35 = vadd.f32 %v1812_v33, %v1095_v52  ;;  %v1224_v56 = vpop.f32.mrb[13].mxu1  ;;  %v1301_v52 = vld [vmem:[#allocation4 + $0x30] sm:$0xff] (!%p1637_p10) }
 0x363   : > { %v1255_v22 = vadd.f32 %v1224_v56, %v1094_v44  ;;  %1294 = sbr.rel (%p1637_p10) target bundleno = 1002 (0x3ea), region = 40 }
 0x364   : > { %1272 = vst.msk [vmem:[#allocation4 + $0x68] sm:$0xff] %vm391_vm2, %v1256_v35  ;;  %v1304_v35 = vld [vmem:[#allocation4 + $0x48] sm:$0xff] (!%p1637_p10)  ;;  %v1303_v56 = vld [vmem:[#allocation4 + $0x40] sm:$0xff] (!%p1637_p10) }
 0x365   : > { %1271 = vst.msk [vmem:[#allocation4 + $0x60] sm:$0xff] %vm391_vm2, %v1255_v22  ;;  %v1815_v16 = vpop.f32.mrb[14].mxu1 }
 0x366   : > { %v1258_v38 = vadd.f32 %v1815_v16, %v1097_v63  ;;  %v1234_v25 = vpop.f32.mrb[15].mxu1 }
 0x367   : > { %v1257_v1 = vadd.f32 %v1234_v25, %v1096_v61 }
 0x368   : > { %1274 = vst.msk [vmem:[#allocation4 + $0x78] sm:$0xff] %vm391_vm2, %v1258_v38  ;;  %v1305_v4 = vld [vmem:[#allocation4 + $0x50] sm:$0xff] (!%p1637_p10) }
 0x369   : > { %1273 = vst.msk [vmem:[#allocation4 + $0x70] sm:$0xff] %vm391_vm2, %v1257_v1  ;;  %v1306_v1 = vld [vmem:[#allocation4 + $0x58] sm:$0xff] (!%p1637_p10) }
 0x36b   : > { %v1308_v28 = vld [vmem:[#allocation4 + $0x68] sm:$0xff] }
 0x36c   : > { %v1307_v50 = vld [vmem:[#allocation4 + $0x60] sm:$0xff] }
 0x36f   : > { %v1310_v2 = vld [vmem:[#allocation4 + $0x78] sm:$0xff] }
 0x370   : > { %v1309_v11 = vld [vmem:[#allocation4 + $0x70] sm:$0xff] }
 0x3be   : > { %v1340_v49 = vpop.permute.xlu1 %1339  ;;  %v1330_v6 = vpop.permute.xlu0 %1329 }
 0x3bf   : > { %2024 = vrcp.f32 %v1340_v49 }
 0x3c0   : > { %2026 = vrcp.f32 %v1330_v6 }
 0x3c2   : > { %v1345_v13 = vpop.permute.xlu1 %1344  ;;  %v1335_v30 = vpop.permute.xlu0 %1334 }
 0x3c3   : > { %2028 = vrcp.f32 %v1345_v13 }
 0x3c4   : > { %2030 = vrcp.f32 %v1335_v30 }
 0x3c6   : > { %v1355_v55 = vpop.permute.xlu1 %1354  ;;  %v1350_v43 = vpop.permute.xlu0 %1349 }
 0x3c7   : > { %2032 = vrcp.f32 %v1355_v55 }
 0x3c8   : > { %2034 = vrcp.f32 %v1350_v43 }
 0x3c9   : > { %v2025_v10 = vpop.eup %2024 }
 0x3ca   : > { %v2027_v21 = vpop.eup %2026  ;;  %v1412_v41 = vmul.f32 %v2025_v10, %v1297_v36  ;;  %v1365_v17 = vpop.permute.xlu1 %1364 }
 0x3cb   : > { %v1360_v42 = vpop.permute.xlu0 %1359  ;;  %v1408_v53 = vmul.f32 %v2027_v21, %v1295_v47  ;;  %2036 = vrcp.f32 %v1365_v17 }
 0x3cc   : > { %1441 = vst.msk [vmem:[%s2189_s5 + $0x10] sm:$0xff] %vm391_vm2, %v1412_v41  ;;  %2038 = vrcp.f32 %v1360_v42 }
 0x3cd   : > { %v2029_v31 = vpop.eup %2028  ;;  %1439 = vst.msk [vmem:[%s2189_s5] sm:$0xff] %vm391_vm2, %v1408_v53 }
 0x3ce   : > { %v2031_v27 = vpop.eup %2030  ;;  %v1414_v24 = vmul.f32 %v2029_v31, %v1298_v46  ;;  %v1375_v32 = vpop.permute.xlu1 %1374 }
 0x3cf   : > { %v1370_v60 = vpop.permute.xlu0 %1369  ;;  %v1410_v58 = vmul.f32 %v2031_v27, %v1296_v15  ;;  %2040 = vrcp.f32 %v1375_v32 }
 0x3d0   : > { %1442 = vst.msk [vmem:[%s2189_s5 + $0x18] sm:$0xff] %vm391_vm2, %v1414_v24  ;;  %2042 = vrcp.f32 %v1370_v60 }
 0x3d1   : > { %v2033_v23 = vpop.eup %2032  ;;  %1440 = vst.msk [vmem:[%s2189_s5 + $0x8] sm:$0xff] %vm391_vm2, %v1410_v58 }
 0x3d2   : > { %v2035_v39 = vpop.eup %2034  ;;  %v1418_v20 = vmul.f32 %v2033_v23, %v1300_v62  ;;  %v1385_v40 = vpop.permute.xlu1 %1384 }
 0x3d3   : > { %v1380_v51 = vpop.permute.xlu0 %1379  ;;  %v1416_v54 = vmul.f32 %v2035_v39, %v1299_v59  ;;  %2044 = vrcp.f32 %v1385_v40 }
 0x3d4   : > { %1444 = vst.msk [vmem:[%s2189_s5 + $0x28] sm:$0xff] %vm391_vm2, %v1418_v20  ;;  %2046 = vrcp.f32 %v1380_v51 }
 0x3d5   : > { %v2037_v44 = vpop.eup %2036  ;;  %1443 = vst.msk [vmem:[%s2189_s5 + $0x20] sm:$0xff] %vm391_vm2, %v1416_v54 }
 0x3d6   : > { %v2039_v57 = vpop.eup %2038  ;;  %v1422_v0 = vmul.f32 %v2037_v44, %v1302_v29  ;;  %v1395_v33 = vpop.permute.xlu1 %1394 }
 0x3d7   : > { %v1390_v3 = vpop.permute.xlu0 %1389  ;;  %v1420_v48 = vmul.f32 %v2039_v57, %v1301_v52  ;;  %2048 = vrcp.f32 %v1395_v33 }
 0x3d8   : > { %1446 = vst.msk [vmem:[%s2189_s5 + $0x38] sm:$0xff] %vm391_vm2, %v1422_v0  ;;  %2050 = vrcp.f32 %v1390_v3 }
 0x3d9   : > { %v2041_v22 = vpop.eup %2040  ;;  %1445 = vst.msk [vmem:[%s2189_s5 + $0x30] sm:$0xff] %vm391_vm2, %v1420_v48 }
 0x3da   : > { %v2043_v63 = vpop.eup %2042  ;;  %v1426_v61 = vmul.f32 %v2041_v22, %v1304_v35  ;;  %v1405_v16 = vpop.permute.xlu1 %1404 }
 0x3db   : > { %v1400_v38 = vpop.permute.xlu0 %1399  ;;  %v1424_v25 = vmul.f32 %v2043_v63, %v1303_v56  ;;  %2052 = vrcp.f32 %v1405_v16 }
 0x3dc   : > { %1448 = vst.msk [vmem:[%s2189_s5 + $0x48] sm:$0xff] %vm391_vm2, %v1426_v61  ;;  %2054 = vrcp.f32 %v1400_v38 }
 0x3dd   : > { %v2045_v18 = vpop.eup %2044  ;;  %1447 = vst.msk [vmem:[%s2189_s5 + $0x40] sm:$0xff] %vm391_vm2, %v1424_v25 }
 0x3de   : > { %v2047_v7 = vpop.eup %2046  ;;  %v1430_v5 = vmul.f32 %v2045_v18, %v1306_v1 }
 0x3df   : > { %v1428_v14 = vmul.f32 %v2047_v7, %v1305_v4 }
 0x3e0   : > { %1450 = vst.msk [vmem:[%s2189_s5 + $0x58] sm:$0xff] %vm391_vm2, %v1430_v5 }
 0x3e1   : > { %v2049_v8 = vpop.eup %2048  ;;  %1449 = vst.msk [vmem:[%s2189_s5 + $0x50] sm:$0xff] %vm391_vm2, %v1428_v14 }
 0x3e2   : > { %v2051_v9 = vpop.eup %2050  ;;  %v1434_v26 = vmul.f32 %v2049_v8, %v1308_v28 }
 0x3e3   : > { %v1432_v45 = vmul.f32 %v2051_v9, %v1307_v50 }
 0x3e4   : > { %1452 = vst.msk [vmem:[%s2189_s5 + $0x68] sm:$0xff] %vm391_vm2, %v1434_v26 }
 0x3e5   : > { %v2053_v37 = vpop.eup %2052  ;;  %1451 = vst.msk [vmem:[%s2189_s5 + $0x60] sm:$0xff] %vm391_vm2, %v1432_v45 }
 0x3e6   : > { %v2055_v34 = vpop.eup %2054  ;;  %v1438_v12 = vmul.f32 %v2053_v37, %v1310_v2 }
 0x3e7   : > { %v1436_v19 = vmul.f32 %v2055_v34, %v1309_v11 }
 0x3e8   : > { %1454 = vst.msk [vmem:[%s2189_s5 + $0x78] sm:$0xff] %vm391_vm2, %v1438_v12 }
 0x3e9   : > { %1453 = vst.msk [vmem:[%s2189_s5 + $0x70] sm:$0xff] %vm391_vm2, %v1436_v19 }
 0x3ea PF: > { %s13_s18 = sadd.s32 1, %s2110_s18   ;;  %s2743_s12 = smov %s2098_s15 }
 0x3eb   : > { %p10_p11 = scmp.ge.s32.totalorder %s13_s18, 18   ;;  %s2744_s13 = smov %s2102_s16 }
 0x3ec   : > { %s2745_s14 = smov %s2106_s17  ;;  %s2746_s15 = smov %s2750_s19 }
 0x3ed   : > { %s2747_s16 = smov %s2754_s20  ;;  %s2748_s17 = smov %s2758_s21 }
 0x3ee   :  { %12 = sbr.rel (!%p10_p11) target bundleno = 4 (0x4), region = 76 }

</bundles_post_ra>
